<compile_context>
chip_gen: v6e
topology: v6e:2x2x1
jax: 0.10.0
libtpu: 0.0.40
codegen_flags: <defaults>
</compile_context>

<pallas_src>
import jax
import jax.numpy as jnp
from jax.experimental import pallas as pl
from jax.experimental.pallas import tpu as pltpu

_PER_BLOCK_BUDGET = 2 * 1024 * 1024   # bytes per block; 2 specs x 2 bufs -> ~8 MiB live
_VMEM_LIMIT_BYTES = 16 * 1024 * 1024  # explicit scoped-VMEM cap (fits v5e/v6e/v7x)
_MIN_SPLIT_BYTES = 1 << 20            # only force a 2-way grid for copies >= 1 MiB


def _copy_kernel(x_ref, o_ref):
    # Both refs are (TB, TF) lane/sublane-dense tiles -> straight vld/vst copy.
    # NOTE: any elementwise epilogue (cast/scale/activation/quantize) fused here
    # is free filler — VPU/EUP slots are idle in this HBM-bound regime.
    o_ref[...] = x_ref[...]


def _sublane_pack(itemsize):
    # 8 rows for 4-byte dtypes, 16 for 2-byte, 32 for 1-byte.
    return max(8, 32 // max(itemsize, 1))


def _fold_lane_dense(b, flat, itemsize):
    """Pick the 2D slab (rows, cols) the kernel copies, preferring cols % 128 == 0."""
    total = b * flat
    if flat >= 128 and flat % 128 == 0:
        return b, flat
    if total % 128 == 0:
        # Fold batch into lanes: largest multiple of 128 that divides total and
        # still fits the per-block budget with a minimal sublane-pack of rows.
        pack = _sublane_pack(itemsize)
        cap = max(128, (_PER_BLOCK_BUDGET // (pack * itemsize)) // 128 * 128)
        best = 128
        c = 128
        while c <= min(total, cap):
            if total % c == 0:
                best = c
            c += 128
        return total // best, best
    # No clean lane-dense factorization; fall back to (b, flat) — edge stores
    # will be masked (correct, minor perf cost).
    return b, flat


def _pick_tiles(rows, cols, itemsize):
    pack = _sublane_pack(itemsize)
    tb_min = min(rows, pack)

    # Lane tile: full extent if it fits the budget with minimal rows, else the
    # largest multiple of 128 that fits (keeps stores unmasked & lane-dense).
    if cols * tb_min * itemsize <= _PER_BLOCK_BUDGET or cols <= 128:
        tf = cols
    else:
        tf = max(128, (_PER_BLOCK_BUDGET // (tb_min * itemsize)) // 128 * 128)
        tf = min(tf, max(128, cols // 128 * 128))

    # Grow the batch tile to fill the budget once tf covers the full extent
    # (collapses many tiny grid steps -> few ~2 MiB steps for tall-batch shapes).
    if tf == cols:
        tb = _PER_BLOCK_BUDGET // max(cols * itemsize, 1)
        tb = max(tb_min, (tb // pack) * pack)
        tb = min(tb, rows)
    else:
        tb = tb_min
    return tb, tf


def _maybe_split_for_two_cores(tb, tf, rows, cols, itemsize):
    """Ensure >=2 grid iterations on a large copy so v7x's 2 TCs both work."""
    grid_r = pl.cdiv(rows, tb)
    grid_c = pl.cdiv(cols, tf)
    if grid_r * grid_c >= 2 or rows * cols * itemsize < _MIN_SPLIT_BYTES:
        return tb, tf
    pack = _sublane_pack(itemsize)
    if rows >= 2 * pack:
        tb = max(pack, (rows // 2 // pack) * pack)
    elif cols >= 256:
        tf = max(128, (cols // 2 // 128) * 128)
    return tb, tf


def flatten(x, use_pallas=True):
    """Pallas equivalent of PyTorch Flatten: x.view(x.size(0), -1)."""
    b = x.shape[0]
    flat = 1
    for d in x.shape[1:]:
        flat *= d

    # Row-major reshape == torch's .view(B, -1); metadata-only in XLA.
    x2d = jnp.reshape(x, (b, flat))
    if not use_pallas:
        # Optimal production path: no kernel, no HBM traffic.
        return x2d

    itemsize = jnp.dtype(x.dtype).itemsize

    # Present a lane-dense slab to the kernel (fold batch into lanes if needed).
    rows, cols = _fold_lane_dense(b, flat, itemsize)
    slab = jnp.reshape(x2d, (rows, cols))

    tb, tf = _pick_tiles(rows, cols, itemsize)
    tb, tf = _maybe_split_for_two_cores(tb, tf, rows, cols, itemsize)
    grid = (pl.cdiv(rows, tb), pl.cdiv(cols, tf))

    out2d = pl.pallas_call(
        _copy_kernel,
        out_shape=jax.ShapeDtypeStruct((rows, cols), x.dtype),
        grid_spec=pltpu.PrefetchScalarGridSpec(
            num_scalar_prefetch=0,
            grid=grid,
            in_specs=[pl.BlockSpec((tb, tf), lambda i, j: (i, j))],
            out_specs=pl.BlockSpec((tb, tf), lambda i, j: (i, j)),
        ),
        compiler_params=pltpu.CompilerParams(
            dimension_semantics=("parallel", "parallel"),
            vmem_limit_bytes=_VMEM_LIMIT_BYTES,
        ),
        cost_estimate=pl.CostEstimate(
            flops=0,
            transcendentals=0,
            bytes_accessed=2 * rows * cols * itemsize,
        ),
    )(slab)

    # Metadata-only reshape back to the (B, flat) view the module returns.
    return jnp.reshape(out2d, (b, flat))


if __name__ == "__main__":
    key = jax.random.PRNGKey(0)
    # Small NCHW input consistent with a conv-style feature map.
    x = jax.random.normal(key, (2, 4, 16, 16), dtype=jnp.float32)

    out = flatten(x)
    out = jax.block_until_ready(out)

    # Sanity check vs. plain JAX reshape (same semantics as torch .view(B, -1)).
    ref = x.reshape(x.shape[0], -1)
    assert out.shape == (2, 4 * 16 * 16)
    assert jnp.array_equal(out, ref)

    # Also exercise a non-128-multiple flat extent to hit the lane-folding path.
    x2 = jax.random.normal(key, (8, 3, 8, 8), dtype=jnp.float32)  # flat = 192
    out2 = jax.block_until_ready(flatten(x2))
    assert jnp.array_equal(out2, x2.reshape(8, -1))

    print("KERNEL_OK")
</pallas_src>

<mosaic_0001>
module attributes {stable_mosaic.version = 11 : i64} {
  func.func @_copy_kernel(%arg0: i32, %arg1: i32, %arg2: memref<2x1024xf32, #tpu.memory_space<vmem>>, %arg3: memref<2x1024xf32, #tpu.memory_space<vmem>>) attributes {dimension_semantics = [#tpu.dimension_semantics<parallel>, #tpu.dimension_semantics<parallel>], iteration_bounds = array<i64: 1, 1>, scalar_prefetch = 0 : i64, scratch_operands = 0 : i64, tpu.core_type = #tpu.core_type<tc>, window_params = [{transform_indices = @transform_0, window_bounds = array<i64: 2, 1024>}, {transform_indices = @transform_1, window_bounds = array<i64: 2, 1024>}]} {
    %c0 = arith.constant 0 : index
    %c0_0 = arith.constant 0 : index
    %0 = vector.load %arg2[%c0, %c0_0] : memref<2x1024xf32, #tpu.memory_space<vmem>>, vector<2x1024xf32>
    %c0_1 = arith.constant 0 : index
    %c0_2 = arith.constant 0 : index
    %1 = vector.load %arg3[%c0_1, %c0_2] : memref<2x1024xf32, #tpu.memory_space<vmem>>, vector<2x1024xf32>
    tpu.vector_store %arg3[%c0_1, %c0_2], %0 {strides = array<i32>} : memref<2x1024xf32, #tpu.memory_space<vmem>>, vector<2x1024xf32>,
    return
  }
  func.func @transform_0(%arg0: i32, %arg1: i32) -> (i32, i32) {
    %c0_i32 = arith.constant 0 : i32
    return %arg0, %arg1 : i32, i32
  }
  func.func @transform_1(%arg0: i32, %arg1: i32) -> (i32, i32) {
    %c0_i32 = arith.constant 0 : i32
    return %arg0, %arg1 : i32, i32
  }
}

</mosaic_0001>

<bundles_post_ra>
// kernel: tpu_custom_call.1
= control target key start
LH: loop header
LB: loop body
LE: loop exit
PB: predicated region body
PF: predicated region fallthrough
CT: control target
= control target key end

     0   :  { %6 = vsyncpa [#allocation3], 0  ;;  %s104_s0 = inlined_call_operand.hbm [shape: f32[2,1024], index: 0, kind: input, shape index: {}]   ;;  %s105_s1 = inlined_call_operand.hbm [shape: f32[2,1024], index: 1, kind: output, shape index: {}]  }
   0x1   :  { %7 = vsyncpa [#allocation4], 0  ;;  %s86_s6 = smov [#allocation2]  }
   0x2   :  { %s14_s7 = sshll.u32 %s86_s6, 4  ;;  %s15_s7 = int_to_ptr.vmem [resolvable:$true] %s14_s7 }
   0x3   :  { %s50_s8 = scalar_lea.vmem %s15_s7, 256  ;;  %p55_p1 = scmp.lt.s32.totalorder %s15_s7, %s15_s7 }
   0x4   :  { %p51_p0 = scmp.ne.s32.totalorder %s15_s7, %s50_s8  ;;  %p56_p2 = scmp.lt.s32.totalorder %s50_s8, %s50_s8 }
   0x6   :  { %p57_p3 = por %p56_p2, %p55_p1 }
   0x8   :  { %p58_p4 = pnand %p57_p3, %p51_p0 }
   0xa   :  { %61 = shalt.err (!%p58_p4)
}
   0xb   :  { %17 = dma.hbm_to_vmem [thread:$0]  %s104_s0, 256, %s15_s7, [#allocation3]  }
   0xc   :  { %82 = dma.done.wait [#allocation3], 256  }
   0xd   :  { %83 = vsyncadd [#allocation3], 4294967040  ;;  %s87_s11 = smov [#allocation5]   ;;  %v21_v0 = vld [vmem:[#allocation2] sm:$0xff]  ;;  %v22_v1 = vld [vmem:[#allocation2 + $0x8] sm:$0xff] }
   0xe   :  { %s31_s12 = sshll.u32 %s87_s11, 4  ;;  %23 = vst [vmem:[#allocation5] sm:$0xff] %v21_v0  ;;  %24 = vst [vmem:[#allocation5 + $0x8] sm:$0xff] %v22_v1  ;;  %s32_s12 = int_to_ptr.vmem [resolvable:$true] %s31_s12 }
   0xf   :  { %s62_s13 = scalar_lea.vmem %s32_s12, 256  ;;  %p67_p6 = scmp.lt.s32.totalorder %s32_s12, %s32_s12 }
  0x10   :  { %p63_p5 = scmp.ne.s32.totalorder %s32_s12, %s62_s13  ;;  %p68_p7 = scmp.lt.s32.totalorder %s62_s13, %s62_s13 }
  0x12   :  { %p69_p8 = por %p68_p7, %p67_p6 }
  0x14   :  { %p70_p9 = pnand %p69_p8, %p63_p5 }
  0x16   :  { %73 = shalt.err (!%p70_p9)
}
  0x17   :  { %34 = dma.vmem_to_hbm [thread:$0]  %s32_s12, 256, %s105_s1, [#allocation4]  }
  0x18   :  { %84 = dma.done.wait [#allocation4], 256  }
  0x19   :  { %85 = vsyncadd [#allocation4], 4294967040 }
  0x1a   :  { %38 = vsyncpa [#allocation3], 1 }
  0x1b   :  { %39 = vsyncpa [#allocation4], 1 }

</bundles_post_ra>
